<compile_context>
chip_gen: v5e
topology: v5e:2x2
jax: 0.10.0
libtpu: 0.0.40
codegen_flags: <defaults>
</compile_context>

<pallas_src>
import math

import jax
import jax.numpy as jnp
from jax.experimental import pallas as pl
from jax.experimental.pallas import tpu as pltpu

# Small synthetic dims consistent with the module's forward.
D_POLICY = 32     # embed_dim / d_policy  (query & value dim)
D_MODEL = 64      # kdim (board embeddings)
N_HEADS = 4
D_FF = 48
LN_EPS = 1e-5
HEAD_DIM = D_POLICY // N_HEADS

# ---- packed parameter slab layout -------------------------------------------
# Weight slab: (W_ROWS, W_COLS) f32, all sub-blocks start at lane 0 and at
# sublane offsets that are multiples of 8.
_W_QV = 0                        # [wq | wv]   rows 0:Dp,           cols 0:2*Dp
_W_O = D_POLICY                  # wo          rows Dp:2Dp,         cols 0:Dp
_W_F1 = 2 * D_POLICY             # ff lin1     rows 2Dp:3Dp,        cols 0:Dff
_W_K = 3 * D_POLICY              # wk          rows 3Dp:3Dp+Dm,     cols 0:Dp
_W_F2 = 3 * D_POLICY + D_MODEL   # ff lin2     rows ...:+Dff,       cols 0:Dp
W_ROWS = 3 * D_POLICY + D_MODEL + D_FF
W_COLS = 2 * D_POLICY

# Bias / LayerNorm vector slab: one vector per row, padded to W_COLS lanes.
_V_QV, _V_K, _V_O, _V_G1, _V_BE1, _V_FB1, _V_FB2, _V_G2, _V_BE2 = range(9)
V_ROWS = 9

PARAM_NAMES = ["wq", "bq", "wk", "bk", "wv", "bv", "wo", "bo",
               "g1", "be1", "w1", "b1", "w2", "b2", "g2", "be2"]


def _layernorm(x, gamma, beta):
    mu = jnp.mean(x, axis=-1, keepdims=True)
    var = jnp.mean(jnp.square(x - mu), axis=-1, keepdims=True)
    return (x - mu) * jax.lax.rsqrt(var + LN_EPS) * gamma + beta


def decoder_layer_kernel(policy_ref, board_ref, mask_ref, w_ref, vec_ref, out_ref):
    """One grid step processes a tile of `block_b` batch elements in VMEM."""
    f32 = jnp.float32
    bt, s, dp = policy_ref.shape
    n = bt * s

    # Flatten the batch tile: all dense ops run on (Bt*S, D) slabs.
    x = policy_ref[...].reshape(n, dp).astype(f32)           # (N, Dp)
    kv = board_ref[...].reshape(n, D_MODEL).astype(f32)      # (N, Dm)
    mask = mask_ref[...].astype(f32)                         # (S, S) additive

    # ---- fused q|v projection (value source is policy_emb, per the module) ----
    wqv = w_ref[_W_QV:_W_QV + D_POLICY, :]                   # (Dp, 2*Dp)
    qv = jnp.dot(x, wqv, preferred_element_type=f32) + vec_ref[_V_QV:_V_QV + 1, :]
    scale = 1.0 / math.sqrt(HEAD_DIM)
    q = qv[:, :D_POLICY] * scale                             # scale q once
    v = qv[:, D_POLICY:]

    wk = w_ref[_W_K:_W_K + D_MODEL, :D_POLICY]               # (Dm, Dp)
    k = jnp.dot(kv, wk, preferred_element_type=f32) + vec_ref[_V_K:_V_K + 1, :D_POLICY]

    q3 = q.reshape(bt, s, dp)
    k3 = k.reshape(bt, s, dp)
    v3 = v.reshape(bt, s, dp)

    wo = w_ref[_W_O:_W_O + D_POLICY, :D_POLICY]              # (Dp, Dp)

    # Per-head attention, batched over the whole batch tile (3-D einsums).
    # The 4-head loop is unrolled at trace time; accumulating through slices of
    # wo is algebraically identical to concat + output projection.
    attn = None
    for h in range(N_HEADS):
        sl = slice(h * HEAD_DIM, (h + 1) * HEAD_DIM)
        qh, kh, vh = q3[:, :, sl], k3[:, :, sl], v3[:, :, sl]
        scores = jnp.einsum("bqd,bkd->bqk", qh, kh,
                            preferred_element_type=f32) + mask        # (Bt, S, S)
        m = jnp.max(scores, axis=-1, keepdims=True)
        p = jnp.exp(scores - m)
        inv = pl.reciprocal(jnp.sum(p, axis=-1, keepdims=True), approx=True)
        a = p * inv
        oh = jnp.einsum("bqk,bkd->bqd", a, vh,
                        preferred_element_type=f32)                   # (Bt, S, hd)
        contrib = jnp.dot(oh.reshape(n, HEAD_DIM), wo[sl, :],
                          preferred_element_type=f32)                 # (N, Dp)
        attn = contrib if attn is None else attn + contrib
    attn = attn + vec_ref[_V_O:_V_O + 1, :D_POLICY]

    # ---- Add & Norm 1 (dropout == identity in eval mode) ----
    x = _layernorm(x + attn,
                   vec_ref[_V_G1:_V_G1 + 1, :D_POLICY],
                   vec_ref[_V_BE1:_V_BE1 + 1, :D_POLICY])

    # ---- Feed-forward: Linear -> ReLU -> Linear ----
    w1 = w_ref[_W_F1:_W_F1 + D_POLICY, :D_FF]
    h1 = jnp.maximum(
        jnp.dot(x, w1, preferred_element_type=f32) + vec_ref[_V_FB1:_V_FB1 + 1, :D_FF],
        0.0)
    w2 = w_ref[_W_F2:_W_F2 + D_FF, :D_POLICY]
    ff = jnp.dot(h1, w2, preferred_element_type=f32) + vec_ref[_V_FB2:_V_FB2 + 1, :D_POLICY]

    # ---- Add & Norm 2 ----
    x = _layernorm(x + ff,
                   vec_ref[_V_G2:_V_G2 + 1, :D_POLICY],
                   vec_ref[_V_BE2:_V_BE2 + 1, :D_POLICY])

    out_ref[...] = x.reshape(bt, s, dp).astype(out_ref.dtype)


def _pick_block_b(batch):
    """Batch-tile size: tiny batches collapse into one grid step (per-step
    overhead dominates); larger batches get 2+ tiles so v7x's two TensorCores
    both receive work (the batch axis is marked 'parallel')."""
    if batch < 4:
        return max(batch, 1)
    for bb in range(batch // 2, 0, -1):
        if batch % bb == 0:
            return bb
    return 1


def pack_params(p):
    """Pack the 16 small parameter tensors into one weight slab + one vector
    slab (5 kernel inputs total instead of 19)."""
    assert D_FF <= W_COLS
    f32 = jnp.float32
    w = jnp.zeros((W_ROWS, W_COLS), f32)
    w = w.at[_W_QV:_W_QV + D_POLICY, 0:D_POLICY].set(p["wq"].astype(f32))
    w = w.at[_W_QV:_W_QV + D_POLICY, D_POLICY:2 * D_POLICY].set(p["wv"].astype(f32))
    w = w.at[_W_O:_W_O + D_POLICY, 0:D_POLICY].set(p["wo"].astype(f32))
    w = w.at[_W_F1:_W_F1 + D_POLICY, 0:D_FF].set(p["w1"].astype(f32))
    w = w.at[_W_K:_W_K + D_MODEL, 0:D_POLICY].set(p["wk"].astype(f32))
    w = w.at[_W_F2:_W_F2 + D_FF, 0:D_POLICY].set(p["w2"].astype(f32))

    vecs = jnp.zeros((V_ROWS, W_COLS), f32)
    vecs = vecs.at[_V_QV, 0:D_POLICY].set(p["bq"].reshape(-1))
    vecs = vecs.at[_V_QV, D_POLICY:2 * D_POLICY].set(p["bv"].reshape(-1))
    vecs = vecs.at[_V_K, 0:D_POLICY].set(p["bk"].reshape(-1))
    vecs = vecs.at[_V_O, 0:D_POLICY].set(p["bo"].reshape(-1))
    vecs = vecs.at[_V_G1, 0:D_POLICY].set(p["g1"].reshape(-1))
    vecs = vecs.at[_V_BE1, 0:D_POLICY].set(p["be1"].reshape(-1))
    vecs = vecs.at[_V_FB1, 0:D_FF].set(p["b1"].reshape(-1))
    vecs = vecs.at[_V_FB2, 0:D_POLICY].set(p["b2"].reshape(-1))
    vecs = vecs.at[_V_G2, 0:D_POLICY].set(p["g2"].reshape(-1))
    vecs = vecs.at[_V_BE2, 0:D_POLICY].set(p["be2"].reshape(-1))
    return w, vecs


def decoder_layer(policy_emb, board_emb, causal_mask, params, block_b=None):
    """policy_emb: (B,S,Dp), board_emb: (B,S,Dm), causal_mask: (S,S) additive."""
    B, S, Dp = policy_emb.shape
    _, _, Dm = board_emb.shape
    assert Dp == D_POLICY and Dm == D_MODEL

    if block_b is None:
        block_b = _pick_block_b(B)
    assert B % block_b == 0
    grid = (B // block_b,)

    w_slab, vec_slab = pack_params(params)

    def full_spec(shape):
        return pl.BlockSpec(shape, lambda b, _n=len(shape): (0,) * _n)

    in_specs = [
        pl.BlockSpec((block_b, S, Dp), lambda b: (b, 0, 0)),   # policy_emb tile
        pl.BlockSpec((block_b, S, Dm), lambda b: (b, 0, 0)),   # board_emb tile
        full_spec((S, S)),                                     # additive mask
        full_spec((W_ROWS, W_COLS)),                           # packed weights
        full_spec((V_ROWS, W_COLS)),                           # packed biases/LN
    ]

    grid_spec = pltpu.PrefetchScalarGridSpec(
        num_scalar_prefetch=0,
        grid=grid,
        in_specs=in_specs,
        out_specs=pl.BlockSpec((block_b, S, Dp), lambda b: (b, 0, 0)),
    )

    return pl.pallas_call(
        decoder_layer_kernel,
        out_shape=jax.ShapeDtypeStruct((B, S, Dp), policy_emb.dtype),
        grid_spec=grid_spec,
        compiler_params=pltpu.CompilerParams(
            # Batch tiles are independent -> shard across TensorCores on v7x.
            dimension_semantics=("parallel",)),
    )(policy_emb, board_emb, causal_mask, w_slab, vec_slab)


def init_params(key):
    ks = jax.random.split(key, 12)

    def rn(k, shape, scale=0.1):
        return jax.random.normal(k, shape, jnp.float32) * scale

    return {
        # cross-attention (separate q/k/v projections since kdim != embed_dim)
        "wq": rn(ks[0], (D_POLICY, D_POLICY)),
        "bq": rn(ks[1], (1, D_POLICY)),
        "wk": rn(ks[2], (D_MODEL, D_POLICY)),
        "bk": rn(ks[3], (1, D_POLICY)),
        "wv": rn(ks[4], (D_POLICY, D_POLICY)),
        "bv": rn(ks[5], (1, D_POLICY)),
        "wo": rn(ks[6], (D_POLICY, D_POLICY)),
        "bo": rn(ks[7], (1, D_POLICY)),
        # LayerNorm 1
        "g1": jnp.ones((1, D_POLICY), jnp.float32),
        "be1": jnp.zeros((1, D_POLICY), jnp.float32),
        # feed-forward
        "w1": rn(ks[8], (D_POLICY, D_FF)),
        "b1": rn(ks[9], (1, D_FF)),
        "w2": rn(ks[10], (D_FF, D_POLICY)),
        "b2": rn(ks[11], (1, D_POLICY)),
        # LayerNorm 2
        "g2": jnp.ones((1, D_POLICY), jnp.float32),
        "be2": jnp.zeros((1, D_POLICY), jnp.float32),
    }


def reference(policy, board, mask, p):
    """Pure-JAX reference mirroring the PyTorch forward (eval mode)."""
    B, S, Dp = policy.shape
    q = policy @ p["wq"] + p["bq"]
    k = board @ p["wk"] + p["bk"]
    v = policy @ p["wv"] + p["bv"]
    hd = Dp // N_HEADS
    qh = q.reshape(B, S, N_HEADS, hd).transpose(0, 2, 1, 3)
    kh = k.reshape(B, S, N_HEADS, hd).transpose(0, 2, 1, 3)
    vh = v.reshape(B, S, N_HEADS, hd).transpose(0, 2, 1, 3)
    s = jnp.einsum("bhqd,bhkd->bhqk", qh, kh) / math.sqrt(hd) + mask
    a = jax.nn.softmax(s, axis=-1)
    o = jnp.einsum("bhqk,bhkd->bhqd", a, vh).transpose(0, 2, 1, 3).reshape(B, S, Dp)
    attn = o @ p["wo"] + p["bo"]

    def ln(x, g, b):
        mu = x.mean(-1, keepdims=True)
        var = ((x - mu) ** 2).mean(-1, keepdims=True)
        return (x - mu) / jnp.sqrt(var + LN_EPS) * g + b

    x = ln(policy + attn, p["g1"], p["be1"])
    h = jax.nn.relu(x @ p["w1"] + p["b1"])
    x = ln(x + h @ p["w2"] + p["b2"], p["g2"], p["be2"])
    return x


if __name__ == "__main__":
    B, S = 2, 8
    key = jax.random.PRNGKey(0)
    k_pol, k_brd, k_par = jax.random.split(key, 3)

    policy_emb = jax.random.normal(k_pol, (B, S, D_POLICY), jnp.float32)
    board_emb = jax.random.normal(k_brd, (B, S, D_MODEL), jnp.float32)
    # Additive causal mask (float): 0 where allowed, large negative where masked.
    tril = jnp.tril(jnp.ones((S, S), jnp.bool_))
    causal_mask = jnp.where(tril, 0.0, -1e9).astype(jnp.float32)

    params = init_params(k_par)

    out = jax.block_until_ready(
        decoder_layer(policy_emb, board_emb, causal_mask, params))
    ref = reference(policy_emb, board_emb, causal_mask, params)

    assert out.shape == (B, S, D_POLICY)
    # Slightly looser tolerance than exact f32 because the softmax uses the
    # EUP approximate reciprocal (all matmuls / LN stats remain f32).
    assert jnp.allclose(out, ref, atol=2e-3, rtol=2e-3), (
        f"max err {jnp.max(jnp.abs(out - ref))}")

    print("KERNEL_OK")
</pallas_src>

<mosaic_0001>
module attributes {stable_mosaic.version = 11 : i64} {
  func.func @decoder_layer_kernel(%arg0: i32, %arg1: memref<2x8x32xf32, #tpu.memory_space<vmem>>, %arg2: memref<2x8x64xf32, #tpu.memory_space<vmem>>, %arg3: memref<8x8xf32, #tpu.memory_space<vmem>>, %arg4: memref<208x64xf32, #tpu.memory_space<vmem>>, %arg5: memref<9x64xf32, #tpu.memory_space<vmem>>, %arg6: memref<2x8x32xf32, #tpu.memory_space<vmem>>) attributes {dimension_semantics = [#tpu.dimension_semantics<parallel>], iteration_bounds = array<i64: 1>, scalar_prefetch = 0 : i64, scratch_operands = 0 : i64, tpu.core_type = #tpu.core_type<tc>, window_params = [{transform_indices = @transform_0, window_bounds = array<i64: 2, 8, 32>}, {transform_indices = @transform_1, window_bounds = array<i64: 2, 8, 64>}, {pipeline_mode = #tpu.pipeline_mode<synchronous>, transform_indices = @transform_2, window_bounds = array<i64: 8, 8>}, {pipeline_mode = #tpu.pipeline_mode<synchronous>, transform_indices = @transform_3, window_bounds = array<i64: 208, 64>}, {pipeline_mode = #tpu.pipeline_mode<synchronous>, transform_indices = @transform_4, window_bounds = array<i64: 9, 64>}, {transform_indices = @transform_5, window_bounds = array<i64: 2, 8, 32>}]} {
    %c0 = arith.constant 0 : index
    %c0_0 = arith.constant 0 : index
    %c0_1 = arith.constant 0 : index
    %0 = vector.load %arg1[%c0, %c0_0, %c0_1] : memref<2x8x32xf32, #tpu.memory_space<vmem>>, vector<2x8x32xf32>
    %1 = vector.shape_cast %0 : vector<2x8x32xf32> to vector<16x32xf32>
    %c0_2 = arith.constant 0 : index
    %c0_3 = arith.constant 0 : index
    %c0_4 = arith.constant 0 : index
    %2 = vector.load %arg2[%c0_2, %c0_3, %c0_4] : memref<2x8x64xf32, #tpu.memory_space<vmem>>, vector<2x8x64xf32>
    %3 = vector.shape_cast %2 : vector<2x8x64xf32> to vector<16x64xf32>
    %c0_5 = arith.constant 0 : index
    %c0_6 = arith.constant 0 : index
    %4 = vector.load %arg3[%c0_5, %c0_6] : memref<8x8xf32, #tpu.memory_space<vmem>>, vector<8x8xf32>
    %c0_7 = arith.constant 0 : index
    %c0_8 = arith.constant 0 : index
    %5 = vector.load %arg4[%c0_7, %c0_8] : memref<208x64xf32, #tpu.memory_space<vmem>>, vector<32x64xf32>
    %cst = arith.constant dense<0.000000e+00> : vector<16x64xf32>
    %6 = tpu.matmul %1, %5, %cst {dimension_numbers = #tpu.dot_dimension_numbers<[1], [0], [0], [1], [0, 0, 1, 1], [], []>} : vector<16x32xf32>, vector<32x64xf32>, vector<16x64xf32> -> vector<16x64xf32>
    %c0_9 = arith.constant 0 : index
    %c0_10 = arith.constant 0 : index
    %7 = vector.load %arg5[%c0_9, %c0_10] : memref<9x64xf32, #tpu.memory_space<vmem>>, vector<1x64xf32>
    %8 = vector.broadcast %7 : vector<1x64xf32> to vector<16x64xf32>
    %9 = arith.addf %6, %8 : vector<16x64xf32>
    %10 = vector.extract_strided_slice %9 {offsets = [0, 0], sizes = [16, 32], strides = [1, 1]} : vector<16x64xf32> to vector<16x32xf32>
    %cst_11 = arith.constant 0.353553385 : f32
    %11 = vector.broadcast %cst_11 : f32 to vector<16x32xf32>
    %12 = arith.mulf %10, %11 : vector<16x32xf32>
    %13 = vector.extract_strided_slice %9 {offsets = [0, 32], sizes = [16, 32], strides = [1, 1]} : vector<16x64xf32> to vector<16x32xf32>
    %c96 = arith.constant 96 : index
    %c0_12 = arith.constant 0 : index
    %14 = vector.load %arg4[%c96, %c0_12] : memref<208x64xf32, #tpu.memory_space<vmem>>, vector<64x32xf32>
    %cst_13 = arith.constant dense<0.000000e+00> : vector<16x32xf32>
    %15 = tpu.matmul %3, %14, %cst_13 {dimension_numbers = #tpu.dot_dimension_numbers<[1], [0], [0], [1], [0, 0, 1, 1], [], []>} : vector<16x64xf32>, vector<64x32xf32>, vector<16x32xf32> -> vector<16x32xf32>
    %c1 = arith.constant 1 : index
    %c0_14 = arith.constant 0 : index
    %16 = vector.load %arg5[%c1, %c0_14] : memref<9x64xf32, #tpu.memory_space<vmem>>, vector<1x32xf32>
    %17 = vector.broadcast %16 : vector<1x32xf32> to vector<16x32xf32>
    %18 = arith.addf %15, %17 : vector<16x32xf32>
    %19 = vector.shape_cast %12 : vector<16x32xf32> to vector<2x8x32xf32>
    %20 = vector.shape_cast %18 : vector<16x32xf32> to vector<2x8x32xf32>
    %21 = vector.shape_cast %13 : vector<16x32xf32> to vector<2x8x32xf32>
    %c32 = arith.constant 32 : index
    %c0_15 = arith.constant 0 : index
    %22 = vector.load %arg4[%c32, %c0_15] : memref<208x64xf32, #tpu.memory_space<vmem>>, vector<32x32xf32>
    %23 = vector.extract_strided_slice %19 {offsets = [0, 0, 0], sizes = [2, 8, 8], strides = [1, 1, 1]} : vector<2x8x32xf32> to vector<2x8x8xf32>
    %24 = vector.extract_strided_slice %20 {offsets = [0, 0, 0], sizes = [2, 8, 8], strides = [1, 1, 1]} : vector<2x8x32xf32> to vector<2x8x8xf32>
    %25 = vector.extract_strided_slice %21 {offsets = [0, 0, 0], sizes = [2, 8, 8], strides = [1, 1, 1]} : vector<2x8x32xf32> to vector<2x8x8xf32>
    "tpu.trace_start"() <{level = 10 : i32, message = "bqd,bkd->bqk"}> : () -> ()
    %cst_16 = arith.constant dense<0.000000e+00> : vector<2x8x8xf32>
    %26 = tpu.matmul %23, %24, %cst_16 {dimension_numbers = #tpu.dot_dimension_numbers<[2], [2], [1], [1], [0, 0, 0, 1, 1, 1], [0], [0]>} : vector<2x8x8xf32>, vector<2x8x8xf32>, vector<2x8x8xf32> -> vector<2x8x8xf32>
    "tpu.trace_stop"() : () -> ()
    %27 = vector.shape_cast %4 : vector<8x8xf32> to vector<1x8x8xf32>
    %28 = vector.broadcast %27 : vector<1x8x8xf32> to vector<2x8x8xf32>
    %29 = arith.addf %26, %28 : vector<2x8x8xf32>
    %cst_17 = arith.constant dense<0xFF800000> : vector<2x8xf32>
    %30 = vector.multi_reduction <maximumf>, %29, %cst_17 [2] : vector<2x8x8xf32> to vector<2x8xf32>
    %31 = vector.shape_cast %30 : vector<2x8xf32> to vector<2x8x1xf32>
    %32 = vector.broadcast %31 : vector<2x8x1xf32> to vector<2x8x8xf32>
    %33 = arith.subf %29, %32 : vector<2x8x8xf32>
    %34 = math.exp %33 : vector<2x8x8xf32>
    %cst_18 = arith.constant dense<0.000000e+00> : vector<2x8xf32>
    %35 = vector.multi_reduction <add>, %34, %cst_18 [2] : vector<2x8x8xf32> to vector<2x8xf32>
    %36 = vector.shape_cast %35 : vector<2x8xf32> to vector<2x8x1xf32>
    %37 = tpu.reciprocal %36 {approx = true} : vector<2x8x1xf32> -> vector<2x8x1xf32>
    %38 = vector.broadcast %37 : vector<2x8x1xf32> to vector<2x8x8xf32>
    %39 = arith.mulf %34, %38 : vector<2x8x8xf32>
    "tpu.trace_start"() <{level = 10 : i32, message = "bqk,bkd->bqd"}> : () -> ()
    %cst_19 = arith.constant dense<0.000000e+00> : vector<2x8x8xf32>
    %40 = tpu.matmul %39, %25, %cst_19 {dimension_numbers = #tpu.dot_dimension_numbers<[2], [1], [1], [2], [0, 0, 0, 1, 1, 2], [0], [0]>} : vector<2x8x8xf32>, vector<2x8x8xf32>, vector<2x8x8xf32> -> vector<2x8x8xf32>
    "tpu.trace_stop"() : () -> ()
    %41 = vector.shape_cast %40 : vector<2x8x8xf32> to vector<16x8xf32>
    %42 = vector.extract_strided_slice %22 {offsets = [0, 0], sizes = [8, 32], strides = [1, 1]} : vector<32x32xf32> to vector<8x32xf32>
    %cst_20 = arith.constant dense<0.000000e+00> : vector<16x32xf32>
    %43 = tpu.matmul %41, %42, %cst_20 {dimension_numbers = #tpu.dot_dimension_numbers<[1], [0], [0], [1], [0, 0, 1, 1], [], []>} : vector<16x8xf32>, vector<8x32xf32>, vector<16x32xf32> -> vector<16x32xf32>
    %44 = vector.extract_strided_slice %19 {offsets = [0, 0, 8], sizes = [2, 8, 8], strides = [1, 1, 1]} : vector<2x8x32xf32> to vector<2x8x8xf32>
    %45 = vector.extract_strided_slice %20 {offsets = [0, 0, 8], sizes = [2, 8, 8], strides = [1, 1, 1]} : vector<2x8x32xf32> to vector<2x8x8xf32>
    %46 = vector.extract_strided_slice %21 {offsets = [0, 0, 8], sizes = [2, 8, 8], strides = [1, 1, 1]} : vector<2x8x32xf32> to vector<2x8x8xf32>
    "tpu.trace_start"() <{level = 10 : i32, message = "bqd,bkd->bqk"}> : () -> ()
    %cst_21 = arith.constant dense<0.000000e+00> : vector<2x8x8xf32>
    %47 = tpu.matmul %44, %45, %cst_21 {dimension_numbers = #tpu.dot_dimension_numbers<[2], [2], [1], [1], [0, 0, 0, 1, 1, 1], [0], [0]>} : vector<2x8x8xf32>, vector<2x8x8xf32>, vector<2x8x8xf32> -> vector<2x8x8xf32>
    "tpu.trace_stop"() : () -> ()
    %48 = vector.shape_cast %4 : vector<8x8xf32> to vector<1x8x8xf32>
    %49 = vector.broadcast %48 : vector<1x8x8xf32> to vector<2x8x8xf32>
    %50 = arith.addf %47, %49 : vector<2x8x8xf32>
    %cst_22 = arith.constant dense<0xFF800000> : vector<2x8xf32>
    %51 = vector.multi_reduction <maximumf>, %50, %cst_22 [2] : vector<2x8x8xf32> to vector<2x8xf32>
    %52 = vector.shape_cast %51 : vector<2x8xf32> to vector<2x8x1xf32>
    %53 = vector.broadcast %52 : vector<2x8x1xf32> to vector<2x8x8xf32>
    %54 = arith.subf %50, %53 : vector<2x8x8xf32>
    %55 = math.exp %54 : vector<2x8x8xf32>
    %cst_23 = arith.constant dense<0.000000e+00> : vector<2x8xf32>
    %56 = vector.multi_reduction <add>, %55, %cst_23 [2] : vector<2x8x8xf32> to vector<2x8xf32>
    %57 = vector.shape_cast %56 : vector<2x8xf32> to vector<2x8x1xf32>
    %58 = tpu.reciprocal %57 {approx = true} : vector<2x8x1xf32> -> vector<2x8x1xf32>
    %59 = vector.broadcast %58 : vector<2x8x1xf32> to vector<2x8x8xf32>
    %60 = arith.mulf %55, %59 : vector<2x8x8xf32>
    "tpu.trace_start"() <{level = 10 : i32, message = "bqk,bkd->bqd"}> : () -> ()
    %cst_24 = arith.constant dense<0.000000e+00> : vector<2x8x8xf32>
    %61 = tpu.matmul %60, %46, %cst_24 {dimension_numbers = #tpu.dot_dimension_numbers<[2], [1], [1], [2], [0, 0, 0, 1, 1, 2], [0], [0]>} : vector<2x8x8xf32>, vector<2x8x8xf32>, vector<2x8x8xf32> -> vector<2x8x8xf32>
    "tpu.trace_stop"() : () -> ()
    %62 = vector.shape_cast %61 : vector<2x8x8xf32> to vector<16x8xf32>
    %63 = vector.extract_strided_slice %22 {offsets = [8, 0], sizes = [8, 32], strides = [1, 1]} : vector<32x32xf32> to vector<8x32xf32>
    %cst_25 = arith.constant dense<0.000000e+00> : vector<16x32xf32>
    %64 = tpu.matmul %62, %63, %cst_25 {dimension_numbers = #tpu.dot_dimension_numbers<[1], [0], [0], [1], [0, 0, 1, 1], [], []>} : vector<16x8xf32>, vector<8x32xf32>, vector<16x32xf32> -> vector<16x32xf32>
    %65 = arith.addf %43, %64 : vector<16x32xf32>
    %66 = vector.extract_strided_slice %19 {offsets = [0, 0, 16], sizes = [2, 8, 8], strides = [1, 1, 1]} : vector<2x8x32xf32> to vector<2x8x8xf32>
    %67 = vector.extract_strided_slice %20 {offsets = [0, 0, 16], sizes = [2, 8, 8], strides = [1, 1, 1]} : vector<2x8x32xf32> to vector<2x8x8xf32>
    %68 = vector.extract_strided_slice %21 {offsets = [0, 0, 16], sizes = [2, 8, 8], strides = [1, 1, 1]} : vector<2x8x32xf32> to vector<2x8x8xf32>
    "tpu.trace_start"() <{level = 10 : i32, message = "bqd,bkd->bqk"}> : () -> ()
    %cst_26 = arith.constant dense<0.000000e+00> : vector<2x8x8xf32>
    %69 = tpu.matmul %66, %67, %cst_26 {dimension_numbers = #tpu.dot_dimension_numbers<[2], [2], [1], [1], [0, 0, 0, 1, 1, 1], [0], [0]>} : vector<2x8x8xf32>, vector<2x8x8xf32>, vector<2x8x8xf32> -> vector<2x8x8xf32>
    "tpu.trace_stop"() : () -> ()
    %70 = vector.shape_cast %4 : vector<8x8xf32> to vector<1x8x8xf32>
    %71 = vector.broadcast %70 : vector<1x8x8xf32> to vector<2x8x8xf32>
    %72 = arith.addf %69, %71 : vector<2x8x8xf32>
    %cst_27 = arith.constant dense<0xFF800000> : vector<2x8xf32>
    %73 = vector.multi_reduction <maximumf>, %72, %cst_27 [2] : vector<2x8x8xf32> to vector<2x8xf32>
    %74 = vector.shape_cast %73 : vector<2x8xf32> to vector<2x8x1xf32>
    %75 = vector.broadcast %74 : vector<2x8x1xf32> to vector<2x8x8xf32>
    %76 = arith.subf %72, %75 : vector<2x8x8xf32>
    %77 = math.exp %76 : vector<2x8x8xf32>
    %cst_28 = arith.constant dense<0.000000e+00> : vector<2x8xf32>
    %78 = vector.multi_reduction <add>, %77, %cst_28 [2] : vector<2x8x8xf32> to vector<2x8xf32>
    %79 = vector.shape_cast %78 : vector<2x8xf32> to vector<2x8x1xf32>
    %80 = tpu.reciprocal %79 {approx = true} : vector<2x8x1xf32> -> vector<2x8x1xf32>
    %81 = vector.broadcast %80 : vector<2x8x1xf32> to vector<2x8x8xf32>
    %82 = arith.mulf %77, %81 : vector<2x8x8xf32>
    "tpu.trace_start"() <{level = 10 : i32, message = "bqk,bkd->bqd"}> : () -> ()
    %cst_29 = arith.constant dense<0.000000e+00> : vector<2x8x8xf32>
    %83 = tpu.matmul %82, %68, %cst_29 {dimension_numbers = #tpu.dot_dimension_numbers<[2], [1], [1], [2], [0, 0, 0, 1, 1, 2], [0], [0]>} : vector<2x8x8xf32>, vector<2x8x8xf32>, vector<2x8x8xf32> -> vector<2x8x8xf32>
    "tpu.trace_stop"() : () -> ()
    %84 = vector.shape_cast %83 : vector<2x8x8xf32> to vector<16x8xf32>
    %85 = vector.extract_strided_slice %22 {offsets = [16, 0], sizes = [8, 32], strides = [1, 1]} : vector<32x32xf32> to vector<8x32xf32>
    %cst_30 = arith.constant dense<0.000000e+00> : vector<16x32xf32>
    %86 = tpu.matmul %84, %85, %cst_30 {dimension_numbers = #tpu.dot_dimension_numbers<[1], [0], [0], [1], [0, 0, 1, 1], [], []>} : vector<16x8xf32>, vector<8x32xf32>, vector<16x32xf32> -> vector<16x32xf32>
    %87 = arith.addf %65, %86 : vector<16x32xf32>
    %88 = vector.extract_strided_slice %19 {offsets = [0, 0, 24], sizes = [2, 8, 8], strides = [1, 1, 1]} : vector<2x8x32xf32> to vector<2x8x8xf32>
    %89 = vector.extract_strided_slice %20 {offsets = [0, 0, 24], sizes = [2, 8, 8], strides = [1, 1, 1]} : vector<2x8x32xf32> to vector<2x8x8xf32>
    %90 = vector.extract_strided_slice %21 {offsets = [0, 0, 24], sizes = [2, 8, 8], strides = [1, 1, 1]} : vector<2x8x32xf32> to vector<2x8x8xf32>
    "tpu.trace_start"() <{level = 10 : i32, message = "bqd,bkd->bqk"}> : () -> ()
    %cst_31 = arith.constant dense<0.000000e+00> : vector<2x8x8xf32>
    %91 = tpu.matmul %88, %89, %cst_31 {dimension_numbers = #tpu.dot_dimension_numbers<[2], [2], [1], [1], [0, 0, 0, 1, 1, 1], [0], [0]>} : vector<2x8x8xf32>, vector<2x8x8xf32>, vector<2x8x8xf32> -> vector<2x8x8xf32>
    "tpu.trace_stop"() : () -> ()
    %92 = vector.shape_cast %4 : vector<8x8xf32> to vector<1x8x8xf32>
    %93 = vector.broadcast %92 : vector<1x8x8xf32> to vector<2x8x8xf32>
    %94 = arith.addf %91, %93 : vector<2x8x8xf32>
    %cst_32 = arith.constant dense<0xFF800000> : vector<2x8xf32>
    %95 = vector.multi_reduction <maximumf>, %94, %cst_32 [2] : vector<2x8x8xf32> to vector<2x8xf32>
    %96 = vector.shape_cast %95 : vector<2x8xf32> to vector<2x8x1xf32>
    %97 = vector.broadcast %96 : vector<2x8x1xf32> to vector<2x8x8xf32>
    %98 = arith.subf %94, %97 : vector<2x8x8xf32>
    %99 = math.exp %98 : vector<2x8x8xf32>
    %cst_33 = arith.constant dense<0.000000e+00> : vector<2x8xf32>
    %100 = vector.multi_reduction <add>, %99, %cst_33 [2] : vector<2x8x8xf32> to vector<2x8xf32>
    %101 = vector.shape_cast %100 : vector<2x8xf32> to vector<2x8x1xf32>
    %102 = tpu.reciprocal %101 {approx = true} : vector<2x8x1xf32> -> vector<2x8x1xf32>
    %103 = vector.broadcast %102 : vector<2x8x1xf32> to vector<2x8x8xf32>
    %104 = arith.mulf %99, %103 : vector<2x8x8xf32>
    "tpu.trace_start"() <{level = 10 : i32, message = "bqk,bkd->bqd"}> : () -> ()
    %cst_34 = arith.constant dense<0.000000e+00> : vector<2x8x8xf32>
    %105 = tpu.matmul %104, %90, %cst_34 {dimension_numbers = #tpu.dot_dimension_numbers<[2], [1], [1], [2], [0, 0, 0, 1, 1, 2], [0], [0]>} : vector<2x8x8xf32>, vector<2x8x8xf32>, vector<2x8x8xf32> -> vector<2x8x8xf32>
    "tpu.trace_stop"() : () -> ()
    %106 = vector.shape_cast %105 : vector<2x8x8xf32> to vector<16x8xf32>
    %107 = vector.extract_strided_slice %22 {offsets = [24, 0], sizes = [8, 32], strides = [1, 1]} : vector<32x32xf32> to vector<8x32xf32>
    %cst_35 = arith.constant dense<0.000000e+00> : vector<16x32xf32>
    %108 = tpu.matmul %106, %107, %cst_35 {dimension_numbers = #tpu.dot_dimension_numbers<[1], [0], [0], [1], [0, 0, 1, 1], [], []>} : vector<16x8xf32>, vector<8x32xf32>, vector<16x32xf32> -> vector<16x32xf32>
    %109 = arith.addf %87, %108 : vector<16x32xf32>
    %c2 = arith.constant 2 : index
    %c0_36 = arith.constant 0 : index
    %110 = vector.load %arg5[%c2, %c0_36] : memref<9x64xf32, #tpu.memory_space<vmem>>, vector<1x32xf32>
    %111 = vector.broadcast %110 : vector<1x32xf32> to vector<16x32xf32>
    %112 = arith.addf %109, %111 : vector<16x32xf32>
    %113 = arith.addf %1, %112 : vector<16x32xf32>
    %c3 = arith.constant 3 : index
    %c0_37 = arith.constant 0 : index
    %114 = vector.load %arg5[%c3, %c0_37] : memref<9x64xf32, #tpu.memory_space<vmem>>, vector<1x32xf32>
    %c4 = arith.constant 4 : index
    %c0_38 = arith.constant 0 : index
    %115 = vector.load %arg5[%c4, %c0_38] : memref<9x64xf32, #tpu.memory_space<vmem>>, vector<1x32xf32>
    %cst_39 = arith.constant dense<0.000000e+00> : vector<16xf32>
    %116 = vector.multi_reduction <add>, %113, %cst_39 [1] : vector<16x32xf32> to vector<16xf32>
    %117 = vector.shape_cast %116 : vector<16xf32> to vector<16x1xf32>
    %cst_40 = arith.constant 3.200000e+01 : f32
    %118 = vector.broadcast %cst_40 : f32 to vector<16x1xf32>
    %119 = arith.divf %117, %118 : vector<16x1xf32>
    %120 = vector.broadcast %119 : vector<16x1xf32> to vector<16x32xf32>
    %121 = arith.subf %113, %120 : vector<16x32xf32>
    %122 = arith.mulf %121, %121 : vector<16x32xf32>
    %cst_41 = arith.constant dense<0.000000e+00> : vector<16xf32>
    %123 = vector.multi_reduction <add>, %122, %cst_41 [1] : vector<16x32xf32> to vector<16xf32>
    %124 = vector.shape_cast %123 : vector<16xf32> to vector<16x1xf32>
    %cst_42 = arith.constant 3.200000e+01 : f32
    %125 = vector.broadcast %cst_42 : f32 to vector<16x1xf32>
    %126 = arith.divf %124, %125 : vector<16x1xf32>
    %127 = vector.broadcast %119 : vector<16x1xf32> to vector<16x32xf32>
    %128 = arith.subf %113, %127 : vector<16x32xf32>
    %cst_43 = arith.constant 9.99999974E-6 : f32
    %129 = vector.broadcast %cst_43 : f32 to vector<16x1xf32>
    %130 = arith.addf %126, %129 : vector<16x1xf32>
    %131 = math.rsqrt %130 : vector<16x1xf32>
    %132 = vector.broadcast %131 : vector<16x1xf32> to vector<16x32xf32>
    %133 = arith.mulf %128, %132 : vector<16x32xf32>
    %134 = vector.broadcast %114 : vector<1x32xf32> to vector<16x32xf32>
    %135 = arith.mulf %133, %134 : vector<16x32xf32>
    %136 = vector.broadcast %115 : vector<1x32xf32> to vector<16x32xf32>
    %137 = arith.addf %135, %136 : vector<16x32xf32>
    %c64 = arith.constant 64 : index
    %c0_44 = arith.constant 0 : index
    %138 = vector.load %arg4[%c64, %c0_44] : memref<208x64xf32, #tpu.memory_space<vmem>>, vector<32x48xf32>
    %cst_45 = arith.constant dense<0.000000e+00> : vector<16x48xf32>
    %139 = tpu.matmul %137, %138, %cst_45 {dimension_numbers = #tpu.dot_dimension_numbers<[1], [0], [0], [1], [0, 0, 1, 1], [], []>} : vector<16x32xf32>, vector<32x48xf32>, vector<16x48xf32> -> vector<16x48xf32>
    %c5 = arith.constant 5 : index
    %c0_46 = arith.constant 0 : index
    %140 = vector.load %arg5[%c5, %c0_46] : memref<9x64xf32, #tpu.memory_space<vmem>>, vector<1x48xf32>
    %141 = vector.broadcast %140 : vector<1x48xf32> to vector<16x48xf32>
    %142 = arith.addf %139, %141 : vector<16x48xf32>
    %cst_47 = arith.constant 0.000000e+00 : f32
    %143 = vector.broadcast %cst_47 : f32 to vector<16x48xf32>
    %144 = arith.maximumf %142, %143 : vector<16x48xf32>
    %c160 = arith.constant 160 : index
    %c0_48 = arith.constant 0 : index
    %145 = vector.load %arg4[%c160, %c0_48] : memref<208x64xf32, #tpu.memory_space<vmem>>, vector<48x32xf32>
    %cst_49 = arith.constant dense<0.000000e+00> : vector<16x32xf32>
    %146 = tpu.matmul %144, %145, %cst_49 {dimension_numbers = #tpu.dot_dimension_numbers<[1], [0], [0], [1], [0, 0, 1, 1], [], []>} : vector<16x48xf32>, vector<48x32xf32>, vector<16x32xf32> -> vector<16x32xf32>
    %c6 = arith.constant 6 : index
    %c0_50 = arith.constant 0 : index
    %147 = vector.load %arg5[%c6, %c0_50] : memref<9x64xf32, #tpu.memory_space<vmem>>, vector<1x32xf32>
    %148 = vector.broadcast %147 : vector<1x32xf32> to vector<16x32xf32>
    %149 = arith.addf %146, %148 : vector<16x32xf32>
    %150 = arith.addf %137, %149 : vector<16x32xf32>
    %c7 = arith.constant 7 : index
    %c0_51 = arith.constant 0 : index
    %151 = vector.load %arg5[%c7, %c0_51] : memref<9x64xf32, #tpu.memory_space<vmem>>, vector<1x32xf32>
    %c8 = arith.constant 8 : index
    %c0_52 = arith.constant 0 : index
    %152 = vector.load %arg5[%c8, %c0_52] : memref<9x64xf32, #tpu.memory_space<vmem>>, vector<1x32xf32>
    %cst_53 = arith.constant dense<0.000000e+00> : vector<16xf32>
    %153 = vector.multi_reduction <add>, %150, %cst_53 [1] : vector<16x32xf32> to vector<16xf32>
    %154 = vector.shape_cast %153 : vector<16xf32> to vector<16x1xf32>
    %cst_54 = arith.constant 3.200000e+01 : f32
    %155 = vector.broadcast %cst_54 : f32 to vector<16x1xf32>
    %156 = arith.divf %154, %155 : vector<16x1xf32>
    %157 = vector.broadcast %156 : vector<16x1xf32> to vector<16x32xf32>
    %158 = arith.subf %150, %157 : vector<16x32xf32>
    %159 = arith.mulf %158, %158 : vector<16x32xf32>
    %cst_55 = arith.constant dense<0.000000e+00> : vector<16xf32>
    %160 = vector.multi_reduction <add>, %159, %cst_55 [1] : vector<16x32xf32> to vector<16xf32>
    %161 = vector.shape_cast %160 : vector<16xf32> to vector<16x1xf32>
    %cst_56 = arith.constant 3.200000e+01 : f32
    %162 = vector.broadcast %cst_56 : f32 to vector<16x1xf32>
    %163 = arith.divf %161, %162 : vector<16x1xf32>
    %164 = vector.broadcast %156 : vector<16x1xf32> to vector<16x32xf32>
    %165 = arith.subf %150, %164 : vector<16x32xf32>
    %cst_57 = arith.constant 9.99999974E-6 : f32
    %166 = vector.broadcast %cst_57 : f32 to vector<16x1xf32>
    %167 = arith.addf %163, %166 : vector<16x1xf32>
    %168 = math.rsqrt %167 : vector<16x1xf32>
    %169 = vector.broadcast %168 : vector<16x1xf32> to vector<16x32xf32>
    %170 = arith.mulf %165, %169 : vector<16x32xf32>
    %171 = vector.broadcast %151 : vector<1x32xf32> to vector<16x32xf32>
    %172 = arith.mulf %170, %171 : vector<16x32xf32>
    %173 = vector.broadcast %152 : vector<1x32xf32> to vector<16x32xf32>
    %174 = arith.addf %172, %173 : vector<16x32xf32>
    %175 = vector.shape_cast %174 : vector<16x32xf32> to vector<2x8x32xf32>
    %c0_58 = arith.constant 0 : index
    %c0_59 = arith.constant 0 : index
    %c0_60 = arith.constant 0 : index
    %176 = vector.load %arg6[%c0_58, %c0_59, %c0_60] : memref<2x8x32xf32, #tpu.memory_space<vmem>>, vector<2x8x32xf32>
    tpu.vector_store %arg6[%c0_58, %c0_59, %c0_60], %175 {strides = array<i32>} : memref<2x8x32xf32, #tpu.memory_space<vmem>>, vector<2x8x32xf32>,
    return
  }
  func.func @transform_0(%arg0: i32) -> (i32, i32, i32) {
    %c0_i32 = arith.constant 0 : i32
    %c0_i32_0 = arith.constant 0 : i32
    %c0_i32_1 = arith.constant 0 : i32
    return %arg0, %c0_i32, %c0_i32_0 : i32, i32, i32
  }
  func.func @transform_1(%arg0: i32) -> (i32, i32, i32) {
    %c0_i32 = arith.constant 0 : i32
    %c0_i32_0 = arith.constant 0 : i32
    %c0_i32_1 = arith.constant 0 : i32
    return %arg0, %c0_i32, %c0_i32_0 : i32, i32, i32
  }
  func.func @transform_2(%arg0: i32) -> (i32, i32) {
    %c0_i32 = arith.constant 0 : i32
    %c0_i32_0 = arith.constant 0 : i32
    %c0_i32_1 = arith.constant 0 : i32
    return %c0_i32, %c0_i32_0 : i32, i32
  }
  func.func @transform_3(%arg0: i32) -> (i32, i32) {
    %c0_i32 = arith.constant 0 : i32
    %c0_i32_0 = arith.constant 0 : i32
    %c0_i32_1 = arith.constant 0 : i32
    return %c0_i32, %c0_i32_0 : i32, i32
  }
  func.func @transform_4(%arg0: i32) -> (i32, i32) {
    %c0_i32 = arith.constant 0 : i32
    %c0_i32_0 = arith.constant 0 : i32
    %c0_i32_1 = arith.constant 0 : i32
    return %c0_i32, %c0_i32_0 : i32, i32
  }
  func.func @transform_5(%arg0: i32) -> (i32, i32, i32) {
    %c0_i32 = arith.constant 0 : i32
    %c0_i32_0 = arith.constant 0 : i32
    %c0_i32_1 = arith.constant 0 : i32
    return %arg0, %c0_i32, %c0_i32_0 : i32, i32, i32
  }
}

</mosaic_0001>

<bundles_post_ra>
// kernel: tpu_custom_call.1
= control target key start
LH: loop header
LB: loop body
LE: loop exit
PB: predicated region body
PF: predicated region fallthrough
CT: control target
= control target key end

     0   :  { %vm32_vm0 = vcmask 261120   ;;  %s1408_s0 = inlined_call_operand.vmem [shape: f32[2,8,32], index: 0, kind: input, shape index: {}]   ;;  %s1409_s1 = inlined_call_operand.vmem [shape: f32[2,8,64], index: 1, kind: input, shape index: {}]   ;;  %s1410_s2 = inlined_call_operand.vmem [shape: f32[8,8], index: 2, kind: input, shape index: {}]   ;;  %s1411_s3 = inlined_call_operand.vmem [shape: f32[208,64], index: 3, kind: input, shape index: {}]   ;;  %s1412_s4 = inlined_call_operand.vmem [shape: f32[9,64], index: 4, kind: input, shape index: {}]   ;;  %s1413_s5 = inlined_call_operand.hbm [shape: f32[2,8,32], index: 5, kind: output, shape index: {}]  }
   0x1   :  { %v29_v0 = vld [vmem:[%s1411_s3 + $0x18] sm:$0xff]  ;;  %v28_v2 = vld [vmem:[%s1411_s3 + $0x10] sm:$0xff]  ;;  %v27_v4 = vld [vmem:[%s1411_s3 + $0x8] sm:$0xff] }
   0x2   :  { %v71_v1 = vld [vmem:[%s1411_s3 + $0x98] sm:$0xff]  ;;  %51 = vmatpush.msra.mxu0 %v29_v0  ;;  %v70_v3 = vld [vmem:[%s1411_s3 + $0x90] sm:$0xff]  ;;  %v69_v5 = vld [vmem:[%s1411_s3 + $0x88] sm:$0xff] }
   0x3   :  { %89 = vmatpush.msra.mxu1 %v71_v1  ;;  %v26_v6 = vld [vmem:[%s1411_s3] sm:$0xff]  ;;  %v67_v9 = vld [vmem:[%s1411_s3 + $0x78] sm:$0xff]  ;;  %v66_v10 = vld [vmem:[%s1411_s3 + $0x70] sm:$0xff] }
   0x4   :  { %52 = vmatpush.msra.mxu0 %v28_v2  ;;  %v68_v7 = vld [vmem:[%s1411_s3 + $0x80] sm:$0xff] }
   0x5   :  { %90 = vmatpush.msra.mxu1 %v70_v3  ;;  %v1162_v8 = vld [vmem:[%s1408_s0] sm:$0xff] }
   0x6   :  { %53 = vmatpush.msra.mxu0 %v27_v4 }
   0x7   :  { %91 = vmatpush.msra.mxu1 %v69_v5 }
   0x8   :  { %54 = vmatpush.msra.mxu0 %v26_v6 }
   0x9   :  { %92 = vmatpush.msra.mxu1 %v68_v7  ;;  %961 = vmatmul.msk.f32.vlgmr.msra.gmra.mxu0 %vm32_vm0, %v1162_v8 }
   0xa   :  { %10 = vsyncpa [#allocation3], 0  ;;  %v65_v11 = vld [vmem:[%s1411_s3 + $0x68] sm:$0xff]  ;;  %v64_v12 = vld [vmem:[%s1411_s3 + $0x60] sm:$0xff]  ;;  %vm74_vm1 = vcmask 523264   ;;  %vm108_vm2 = vcmask 64512  }
   0xb   :  { %93 = vmatpush.msra.mxu1 %v67_v9  ;;  %v1181_v13 = vld [vmem:[%s1408_s0 + $0x8] sm:$0xff]  ;;  %v23_v14 = vld [vmem:[%s1409_s1] sm:$0xff]  ;;  %s1094_s0 = smov 96   ;;  %s1096_s29 = smov 112   ;;  %vm857_vm10 = vcmask 392192  }
   0xc   :  { %v24_v15 = vld [vmem:[%s1409_s1 + $0x8] sm:$0xff]  ;;  %v1017_v16 = vld [vmem:[%s1412_s4] ss:$0 sm:$0xff]  ;;  %v1018_v19 = vld [vmem:[%s1412_s4 + $0x1] ss:$0 sm:$0xff]  ;;  %s1095_s1 = smov 120  }
   0xd   :  { %94 = vmatpush.msra.mxu1 %v66_v10  ;;  %v1233_v33 = vld [vmem:[%s1410_s2] sm:$0xff]  ;;  %s1097_s2 = smov 88   ;;  %s1098_s7 = smov 104  }
   0xe   :  { %s1099_s8 = smov 80   ;;  %s1100_s15 = smov 72  }
   0xf   :  { %95 = vmatpush.msra.mxu1 %v65_v11  ;;  %s1102_s23 = smov [#allocation2]   ;;  %s1104_s27 = smov 8  }
  0x10   :  { %s947_s24 = sshll.u32 %s1102_s23, 4  ;;  %s948_s24 = int_to_ptr.vmem [resolvable:$true] %s947_s24 }
  0x11   :  { %96 = vmatpush.msra.mxu1 %v64_v12  ;;  %962 = vmatmul.msk.f32.gmra.mxu0 %vm32_vm0, %v1181_v13 }
  0x12   :  { %963 = vmatmul.msk.f32.vlgmr.msra.gmra.mxu1 %vm74_vm1, %v23_v14 }
  0x1a   :  { %964 = vmatmul.msk.f32.gmra.mxu1 %vm74_vm1, %v24_v15 }
  0x86   :  { %v56_v17 = vpop.f32.mrf.mxu0 }
  0x87   :  { %v1194_v18 = vadd.f32 %v1017_v16, %v56_v17 }
  0x89   :  { %184 = vrot.lane.b32.xlu2 %v1194_v18, %s1094_s0  ;;  %v1205_v24 = vmul.f32 0.35355338, %v1194_v18 }
  0x8e   :  { %v59_v20 = vpop.f32.mrf.mxu0 }
  0x8f   :  { %v98_v21 = vpop.f32.mrf.mxu1  ;;  %v1200_v22 = vadd.f32 %v1017_v16, %v59_v20 }
  0x90   :  { %v1202_v23 = vadd.f32 %v1018_v19, %v98_v21 }
  0x91   :  { %211 = vrot.lane.b32.xlu2 %v1200_v22, %s1094_s0  ;;  %v1215_v27 = vmul.f32 0.35355338, %v1200_v22  ;;  %v1012_v62 = vpack.i.bf16 %v1200_v22, %v1194_v18  ;;  %s949_s0 = sshll.u32 %s1413_s5, 4  ;;  %s950_s0 = int_to_ptr.hbm [resolvable:$true] %s949_s0 }
  0x92   :  { %965 = vmatpush.xpose.msk.msrb.mxu0 %vm108_vm2, %v1202_v23 }
  0x95   :  { %966 = vmatmul.msk.f32.vlgmr.msrb.gmra.mxu0 %vm108_vm2, %v1205_v24 }
  0x97   :  { %v101_v25 = vpop.f32.mrf.mxu1 }
  0x98   :  { %v1212_v26 = vadd.f32 %v1018_v19, %v101_v25 }
  0x99   :  { %237 = vrot.lane.b32.xlu2 %v1205_v24, %s1095_s1 }
  0x9a   :  { %967 = vmatpush.xpose.msk.msra.mxu3 %vm108_vm2, %v1212_v26 }
  0x9d   :  { %968 = vmatmul.msk.f32.vlgmr.msra.gmra.mxu3 %vm108_vm2, %v1215_v27 }
  0xa1   :  { %265 = vrot.lane.b32.xlu2 %v1215_v27, %s1095_s1 }
  0xa9   :  { %427 = vrot.lane.b32.xlu2 %v1202_v23, %s1096_s29 }
  0xb1   :  { %455 = vrot.lane.b32.xlu2 %v1212_v26, %s1096_s29 }
  0xe3   :  { %v185_v28 = vpop.permute.xlu2 %184 }
  0xe4   :  { %205 = vmatpush.msra.mxu2 %v185_v28 }
  0xeb   :  { %v212_v29 = vpop.permute.xlu2 %211 }
  0xec   :  { %232 = vmatpush.msrb.mxu2 %v212_v29 }
  0xf3   :  { %v238_v30 = vpop.permute.xlu2 %237 }
  0xfb   :  { %v266_v31 = vpop.permute.xlu2 %265 }
 0x103   :  { %v428_v32 = vpop.permute.xlu2 %427 }
 0x104   :  { %981 = vmatpush.xpose.msk.msrb.mxu1 %vm108_vm2, %v428_v32 }
 0x10b   :  { %v456_v17 = vpop.permute.xlu2 %455 }
 0x112   :  { %v132_v34 = vpop.f32.mrf.mxu0 }
 0x113   :  { %v133_v35 = vadd.f32 %v132_v34, %v1233_v33 }
 0x115   :  { %v161_v36 = vsel %vm108_vm2, %v133_v35, -inf }
 0x116   :  { %162 = vmax.xlane.f32.xlu0 %v161_v36 }
 0x120   :  { %v158_v37 = vpop.f32.mrf.mxu3 }
 0x121   :  { %v159_v38 = vadd.f32 %v158_v37, %v1233_v33 }
 0x123   :  { %v164_v39 = vsel %vm108_vm2, %v159_v38, -inf }
 0x124   :  { %165 = vmax.xlane.f32.xlu0 %v164_v39 }
 0x138   :  { %239 = vrot.lane.b32.xlu0 %v1202_v23, %s1095_s1 }
 0x140   :  { %425 = vrot.lane.b32.xlu0 %v1205_v24, %s1096_s29 }
 0x189   :  { %v163_v40 = vpop.xlane.xlu0 %162 }
 0x18a   :  { %v167_v41 = vsub.f32 %v133_v35, %v163_v40 }
 0x18c   :  { %v169_v42 = vmul.f32 1.442695, %v167_v41 }
 0x18e   :  { %1026 = vpow2.f32 %v169_v42 }
 0x194   :  { %v1027_v43 = vpop.eup %1026 }
 0x195   :  { %v173_v44 = vsel %vm108_vm2, %v1027_v43, 0.0 }
 0x196   :  { %174 = vadd.xlane.f32.xlu1 %v173_v44 }
 0x197   :  { %v166_v45 = vpop.xlane.xlu0 %165 }
 0x198   :  { %v168_v46 = vsub.f32 %v159_v38, %v166_v45 }
 0x19a   :  { %v171_v47 = vmul.f32 1.442695, %v168_v46 }
 0x19c   :  { %1028 = vpow2.f32 %v171_v47  ;;  %v105_v47 = vld [vmem:[%s1411_s3 + $0x28] sm:$0xff] }
 0x1a2   :  { %v1029_v48 = vpop.eup %1028 }
 0x1a3   :  { %v176_v49 = vsel %vm108_vm2, %v1029_v48, 0.0 }
 0x1a4   :  { %177 = vadd.xlane.f32.xlu1 %v176_v49 }
 0x1aa   :  { %v240_v50 = vpop.permute.xlu0 %239 }
 0x1b2   :  { %v426_v51 = vpop.permute.xlu0 %425 }
 0x1b3   :  { %982 = vmatmul.msk.f32.vlgmr.msrb.gmra.mxu1 %vm108_vm2, %v426_v51 }
 0x1bd   :  { %267 = vrot.lane.b32.xlu1 %v1212_v26, %s1095_s1 }
 0x209   :  { %v175_v52 = vpop.xlane.xlu1 %174 }
 0x20a   :  { %1030 = vrcp.f32 %v175_v52 }
 0x210   :  { %v1031_v53 = vpop.eup %1030 }
 0x211   :  { %v181_v54 = vmul.f32 %v1031_v53, %v1027_v43 }
 0x213   :  { %969 = vmatmul.msk.f32.vlgmr.msra.gmra.mxu2 %vm108_vm2, %v181_v54 }
 0x214   :  { %971 = vmatpush.xpose.msk.msra.mxu2 %vm108_vm2, %v240_v50 }
 0x217   :  { %v178_v55 = vpop.xlane.xlu1 %177 }
 0x218   :  { %1032 = vrcp.f32 %v178_v55 }
 0x21e   :  { %v1033_v56 = vpop.eup %1032 }
 0x21f   :  { %v182_v57 = vmul.f32 %v1033_v56, %v1029_v48  ;;  %v106_v48 = vld [vmem:[%s1411_s3 + $0x30] sm:$0xff] }
 0x221   :  { %970 = vmatmul.msk.f32.vlgmr.msrb.gmra.mxu2 %vm108_vm2, %v182_v57 }
 0x229   :  { %972 = vmatmul.msk.f32.vlgmr.msra.gmra.mxu2 %vm108_vm2, %v238_v30 }
 0x22f   :  { %v268_v58 = vpop.permute.xlu1 %267 }
 0x230   :  { %973 = vmatpush.xpose.msk.msrb.mxu3 %vm108_vm2, %v268_v58  ;;  %v450_v59 = vpop.f32.mrf.mxu1 }
 0x231   :  { %v451_v60 = vadd.f32 %v450_v59, %v1233_v33 }
 0x233   :  { %974 = vmatmul.msk.f32.vlgmr.msrb.gmra.mxu3 %vm108_vm2, %v266_v31  ;;  %v481_v61 = vsel %vm108_vm2, %v451_v60, -inf }
 0x234   :  { %482 = vmax.xlane.f32.xlu0 %v481_v61  ;;  %388 = vmatpush.msra.mxu3 %v105_v47 }
 0x236   :  { %576 = vmatpush.msrb.mxu3 %v106_v48 }
 0x248   :  { %1013 = vrot.lane.b32.xlu0 %v1012_v62, %s1097_s2 }
 0x296   :  { %v1258_v63 = vpop.f32.mrf.mxu2 }
 0x2a4   :  { %v1260_v0 = vpop.f32.mrf.mxu2 }
 0x2a7   :  { %v483_v1 = vpop.xlane.xlu0 %482 }
 0x2a8   :  { %v487_v2 = vsub.f32 %v451_v60, %v483_v1 }
 0x2aa   :  { %v489_v3 = vmul.f32 1.442695, %v487_v2 }
 0x2ac   :  { %1034 = vpow2.f32 %v489_v3  ;;  %v262_v4 = vpop.f32.mrf.mxu2 }
 0x2ad   :  { %v263_v5 = vadd.f32 %v262_v4, %v1233_v33 }
 0x2af   :  { %v293_v6 = vsel %vm108_vm2, %v263_v5, -inf }
 0x2b0   :  { %294 = vmax.xlane.f32.xlu2 %v293_v6 }
 0x2b2   :  { %v1035_v7 = vpop.eup %1034 }
 0x2b3   :  { %v493_v9 = vsel %vm108_vm2, %v1035_v7, 0.0 }
 0x2b4   :  { %494 = vadd.xlane.f32.xlu0 %v493_v9 }
 0x2b6   :  { %v290_v10 = vpop.f32.mrf.mxu3 }
 0x2b7   :  { %v291_v11 = vadd.f32 %v290_v10, %v1233_v33 }
 0x2b9   :  { %v296_v12 = vsel %vm108_vm2, %v291_v11, -inf }
 0x2ba   :  { %297 = vmax.xlane.f32.xlu1 %v296_v12  ;;  %v1014_v14 = vpop.permute.xlu0 %1013 }
 0x2bb   :  { %v1016_v15 = vunpack.i.h.bf16 %v1014_v14  ;;  %v1015_v16 = vunpack.i.l.bf16 %v1014_v14 }
 0x2bd   :  { %336 = vmatpush.msra.mxu0 %v1015_v16  ;;  %362 = vmatpush.msrb.mxu2 %v1016_v15 }
 0x2bf   :  { %983 = vmatpush.xpose.msk.msra.mxu2 %vm108_vm2, %v456_v17 }
 0x2c8   :  { %588 = vrot.lane.b32.xlu2 %v1202_v23, %s1098_s7  ;;  %v104_v23 = vld [vmem:[%s1411_s3 + $0x20] sm:$0xff] }
 0x2c9   :  { %417 = vmatpush.msrb.mxu0 %v104_v23 }
 0x2d3   :  { %453 = vrot.lane.b32.xlu1 %v1215_v27, %s1096_s29 }
 0x323   :  { %v295_v19 = vpop.xlane.xlu2 %294 }
 0x324   :  { %v299_v20 = vsub.f32 %v263_v5, %v295_v19 }
 0x326   :  { %v301_v21 = vmul.f32 1.442695, %v299_v20 }
 0x327   :  { %v495_v36 = vpop.xlane.xlu0 %494 }
 0x328   :  { %1036 = vpow2.f32 %v301_v21 }
 0x32b   :  { %v589_v35 = vpop.permute.xlu2 %588 }
 0x32d   :  { %v298_v25 = vpop.xlane.xlu1 %297 }
 0x32e   :  { %v1037_v28 = vpop.eup %1036  ;;  %v300_v29 = vsub.f32 %v291_v11, %v298_v25 }
 0x32f   :  { %v305_v30 = vsel %vm108_vm2, %v1037_v28, 0.0 }
 0x330   :  { %v303_v31 = vmul.f32 1.442695, %v300_v29  ;;  %306 = vadd.xlane.f32.xlu2 %v305_v30 }
 0x332   :  { %1038 = vpow2.f32 %v303_v31  ;;  %v107_v31 = vld [vmem:[%s1411_s3 + $0x38] sm:$0xff] }
 0x333   :  { %1040 = vrcp.f32 %v495_v36 }
 0x338   :  { %v1039_v32 = vpop.eup %1038 }
 0x339   :  { %v308_v34 = vsel %vm108_vm2, %v1039_v32, 0.0  ;;  %v1041_v39 = vpop.eup %1040 }
 0x33a   :  { %309 = vadd.xlane.f32.xlu1 %v308_v34  ;;  %v501_v41 = vmul.f32 %v1041_v39, %v1035_v7 }
 0x345   :  { %v454_v38 = vpop.permute.xlu1 %453 }
 0x348   :  { %503 = vrot.lane.b32.xlu2 %v1194_v18, %s1099_s8 }
 0x350   :  { %614 = vrot.lane.b32.xlu2 %v1215_v27, %s1098_s7 }
 0x353   :  { %586 = vrot.lane.b32.xlu1 %v1205_v24, %s1098_s7 }
 0x35b   :  { %616 = vrot.lane.b32.xlu1 %v1212_v26, %s1098_s7 }
 0x3a3   :  { %v307_v37 = vpop.xlane.xlu2 %306 }
 0x3a4   :  { %1042 = vrcp.f32 %v307_v37 }
 0x3aa   :  { %v1043_v40 = vpop.eup %1042 }
 0x3ab   :  { %v313_v42 = vmul.f32 %v1043_v40, %v1037_v28  ;;  %v504_v27 = vpop.permute.xlu2 %503  ;;  %v1019_v40 = vld [vmem:[%s1412_s4 + $0x2] ss:$0 sm:$0xff] }
 0x3ac   :  { %524 = vmatpush.msra.mxu1 %v504_v27 }
 0x3ad   :  { %v310_v24 = vpop.xlane.xlu1 %309  ;;  %975 = vmatmul.msk.f32.vlgmr.msra.gmra.mxu0 %vm108_vm2, %v313_v42  ;;  %985 = vmatmul.msk.f32.vlgmr.msra.gmra.mxu1 %vm108_vm2, %v501_v41 }
 0x3ae   :  { %1044 = vrcp.f32 %v310_v24  ;;  %989 = vmatpush.xpose.msk.msra.mxu0 %vm108_vm2, %v589_v35 }
 0x3b3   :  { %v615_v46 = vpop.permute.xlu2 %614 }
 0x3b4   :  { %v1045_v26 = vpop.eup %1044 }
 0x3b5   :  { %v314_v43 = vmul.f32 %v1045_v26, %v1039_v32  ;;  %979 = vmatmul.msk.f32.vlgmr.msrb.gmra.mxu0 %vm108_vm2, %v1258_v63 }
 0x3b7   :  { %976 = vmatmul.msk.f32.vlgmr.msrb.gmra.mxu2 %vm108_vm2, %v314_v43 }
 0x3bd   :  { %980 = vmatmul.msk.f32.gmra.mxu0 %vm108_vm2, %v1260_v0 }
 0x3bf   :  { %984 = vmatmul.msk.f32.vlgmr.msra.gmra.mxu2 %vm108_vm2, %v454_v38 }
 0x3c5   :  { %v587_v44 = vpop.permute.xlu1 %586 }
 0x3c6   :  { %990 = vmatmul.msk.f32.vlgmr.msra.gmra.mxu0 %vm108_vm2, %v587_v44 }
 0x3cd   :  { %v617_v45 = vpop.permute.xlu1 %616 }
 0x3ce   :  { %991 = vmatpush.xpose.msk.msrb.mxu1 %vm108_vm2, %v617_v45 }
 0x3d1   :  { %992 = vmatmul.msk.f32.vlgmr.msrb.gmra.mxu1 %vm108_vm2, %v615_v46 }
 0x3d2   :  { %737 = vmatpush.msra.mxu1 %v107_v31 }
 0x42a   :  { %v338_v49 = vpop.f32.mrf.mxu0  ;;  %v526_v53 = vpop.f32.mrf.mxu1 }
 0x42b   :  { %977 = vmatmul.msk.f32.vlgmr.msra.gmra.mxu3 %vm108_vm2, %v338_v49 }
 0x432   :  { %v1300_v50 = vpop.f32.mrf.mxu0 }
 0x43a   :  { %v364_v51 = vpop.f32.mrf.mxu2  ;;  %v1302_v52 = vpop.f32.mrf.mxu0 }
 0x43b   :  { %978 = vmatmul.msk.f32.gmra.mxu3 %vm108_vm2, %v364_v51  ;;  %v1101_v51 = vmov 32.0  }
 0x442   :  { %v478_v54 = vpop.f32.mrf.mxu2 }
 0x443   :  { %v479_v55 = vadd.f32 %v478_v54, %v1233_v33  ;;  %987 = vmatmul.msk.f32.vlgmr.msrb.gmra.mxu3 %vm108_vm2, %v526_v53  ;;  %v611_v56 = vpop.f32.mrf.mxu0 }
 0x444   :  { %v612_v57 = vadd.f32 %v611_v56, %v1233_v33 }
 0x445   :  { %v484_v58 = vsel %vm108_vm2, %v479_v55, -inf }
 0x446   :  { %485 = vmax.xlane.f32.xlu1 %v484_v58  ;;  %v642_v59 = vsel %vm108_vm2, %v612_v57, -inf }
 0x447   :  { %643 = vmax.xlane.f32.xlu2 %v642_v59 }
 0x44e   :  { %v639_v60 = vpop.f32.mrf.mxu1 }
 0x44f   :  { %v640_v61 = vadd.f32 %v639_v60, %v1233_v33 }
 0x451   :  { %v645_v62 = vsel %vm108_vm2, %v640_v61, -inf }
 0x452   :  { %646 = vmax.xlane.f32.xlu0 %v645_v62 }
 0x45f   :  { %664 = vrot.lane.b32.xlu1 %v1194_v18, %s1100_s15 }
 0x4ae   :  { %v390_v35 = vpop.f32.mrf.mxu3 }
 0x4af   :  { %v420_v38 = vadd.f32 %v1300_v50, %v390_v35 }
 0x4b9   :  { %v486_v63 = vpop.xlane.xlu1 %485 }
 0x4ba   :  { %v488_v0 = vsub.f32 %v479_v55, %v486_v63  ;;  %v644_v1 = vpop.xlane.xlu2 %643 }
 0x4bb   :  { %v648_v3 = vsub.f32 %v612_v57, %v644_v1 }
 0x4bc   :  { %v491_v2 = vmul.f32 1.442695, %v488_v0 }
 0x4bd   :  { %v650_v4 = vmul.f32 1.442695, %v648_v3  ;;  %v814_v3 = vld [vmem:[%s1411_s3 + $0x50] sm:$0xff] }
 0x4be   :  { %1046 = vpow2.f32 %v491_v2  ;;  %v393_v36 = vpop.f32.mrf.mxu3  ;;  %v815_v2 = vld [vmem:[%s1411_s3 + $0x58] sm:$0xff] }
 0x4bf   :  { %1048 = vpow2.f32 %v650_v4  ;;  %v423_v26 = vadd.f32 %v1302_v52, %v393_v36  ;;  %v813_v4 = vld [vmem:[%s1411_s3 + $0x48] sm:$0xff] }
 0x4c4   :  { %v1047_v5 = vpop.eup %1046 }
 0x4c5   :  { %v647_v6 = vpop.xlane.xlu0 %646  ;;  %v496_v7 = vsel %vm108_vm2, %v1047_v5, 0.0  ;;  %v1049_v10 = vpop.eup %1048 }
 0x4c6   :  { %v649_v9 = vsub.f32 %v640_v61, %v647_v6  ;;  %497 = vadd.xlane.f32.xlu0 %v496_v7  ;;  %v654_v11 = vsel %vm108_vm2, %v1049_v10, 0.0  ;;  %v578_v37 = vpop.f32.mrf.mxu3 }
 0x4c7   :  { %v584_v39 = vadd.f32 %v578_v37, %v420_v38 }
 0x4c8   :  { %v652_v33 = vmul.f32 1.442695, %v649_v9 }
 0x4ca   :  { %1050 = vpow2.f32 %v652_v33  ;;  %v854_v33 = vld [vmem:[%s1411_s3 + $0xc8] sm:$0xff] }
 0x4cb   :  { %874 = vmatpush.msra.mxu3 %v854_v33 }
 0x4ce   :  { %655 = vadd.xlane.f32.xlu0 %v654_v11  ;;  %v852_v11 = vld [vmem:[%s1411_s3 + $0xb8] sm:$0xff] }
 0x4d0   :  { %v1051_v18 = vpop.eup %1050 }
 0x4d1   :  { %v657_v12 = vsel %vm108_vm2, %v1051_v18, 0.0  ;;  %v665_v29 = vpop.permute.xlu1 %664 }
 0x4d2   :  { %658 = vadd.xlane.f32.xlu2 %v657_v12 }
 0x4e2   :  { %529 = vrot.lane.b32.xlu0 %v1200_v22, %s1099_s8 }
 0x4ea   :  { %690 = vrot.lane.b32.xlu2 %v1200_v22, %s1100_s15 }
 0x539   :  { %v498_v14 = vpop.xlane.xlu0 %497 }
 0x541   :  { %v656_v17 = vpop.xlane.xlu0 %655 }
 0x545   :  { %v659_v15 = vpop.xlane.xlu2 %658 }
 0x546   :  { %1052 = vrcp.f32 %v659_v15 }
 0x547   :  { %1054 = vrcp.f32 %v498_v14 }
 0x548   :  { %1056 = vrcp.f32 %v656_v17 }
 0x549   :  { %1058 = vrcp.f32 %v1101_v51 }
 0x54c   :  { %v1053_v16 = vpop.eup %1052 }
 0x54d   :  { %v663_v19 = vmul.f32 %v1053_v16, %v1051_v18  ;;  %v691_v20 = vpop.permute.xlu2 %690  ;;  %v1055_v21 = vpop.eup %1054 }
 0x54e   :  { %711 = vmatpush.msrb.mxu0 %v691_v20  ;;  %v502_v25 = vmul.f32 %v1055_v21, %v1047_v5  ;;  %v1057_v22 = vpop.eup %1056  ;;  %v812_v5 = vld [vmem:[%s1411_s3 + $0x40] sm:$0xff] }
 0x54f   :  { %994 = vmatmul.msk.f32.vlgmr.msrb.gmra.mxu0 %vm108_vm2, %v663_v19  ;;  %v662_v30 = vmul.f32 %v1057_v22, %v1049_v10  ;;  %v1059_v53 = vpop.eup %1058  ;;  %v853_v10 = vld [vmem:[%s1411_s3 + $0xc0] sm:$0xff] }
 0x550   :  { %v762_v54 = vmul.f32 32.0, %v1059_v53  ;;  %vm766_vm3 = vweird.f32 %v1059_v53  ;;  %875 = vmatpush.msra.mxu3 %v853_v10 }
 0x552   :  { %v763_v55 = vsub.f32 1.0, %v762_v54  ;;  %876 = vmatpush.msra.mxu3 %v852_v11 }
 0x554   :  { %v530_v28 = vpop.permute.xlu0 %529  ;;  %v764_v52 = vmul.f32 %v1059_v53, %v763_v55 }
 0x555   :  { %550 = vmatpush.msrb.mxu2 %v530_v28 }
 0x556   :  { %986 = vmatmul.msk.f32.vlgmr.msrb.gmra.mxu2 %vm108_vm2, %v502_v25  ;;  %v765_v56 = vadd.f32 %v1059_v53, %v764_v52 }
 0x557   :  { %685 = vmatpush.msra.mxu2 %v665_v29  ;;  %v1020_v29 = vld [vmem:[%s1412_s4 + $0x3] ss:$0 sm:$0xff] }
 0x559   :  { %836 = vmatpush.msrb.mxu2 %v815_v2 }
 0x55b   :  { %837 = vmatpush.msrb.mxu2 %v814_v3 }
 0x55d   :  { %838 = vmatpush.msrb.mxu2 %v813_v4 }
 0x55e   :  { %993 = vmatmul.msk.f32.vlgmr.msra.gmra.mxu2 %vm108_vm2, %v662_v30 }
 0x55f   :  { %839 = vmatpush.msrb.mxu2 %v812_v5 }
 0x5cc   :  { %v713_v23 = vpop.f32.mrf.mxu0 }
 0x5d9   :  { %v552_v32 = vpop.f32.mrf.mxu2 }
 0x5da   :  { %988 = vmatmul.msk.f32.gmra.mxu3 %vm108_vm2, %v552_v32  ;;  %v1021_v32 = vld [vmem:[%s1412_s4 + $0x4] ss:$0 sm:$0xff] }
 0x5e1   :  { %v687_v34 = vpop.f32.mrf.mxu2 }
 0x5e2   :  { %995 = vmatmul.msk.f32.vlgmr.msra.gmra.mxu1 %vm108_vm2, %v687_v34 }
 0x5ea   :  { %996 = vmatmul.msk.f32.gmra.mxu1 %vm108_vm2, %v713_v23 }
 0x65d   :  { %v581_v24 = vpop.f32.mrf.mxu3 }
 0x65e   :  { %v585_v44 = vadd.f32 %v581_v24, %v423_v26  ;;  %v849_v24 = vld [vmem:[%s1411_s3 + $0xa0] sm:$0xff] }
 0x65f   :  { %v739_v41 = vpop.f32.mrf.mxu1  ;;  %v1022_v26 = vld [vmem:[%s1412_s4 + $0x5] ss:$0 sm:$0xff] }
 0x660   :  { %v745_v42 = vadd.f32 %v739_v41, %v584_v39 }
 0x662   :  { %v749_v27 = vadd.f32 %v1019_v40, %v745_v42  ;;  %v851_v42 = vld [vmem:[%s1411_s3 + $0xb0] sm:$0xff] }
 0x663   :  { %877 = vmatpush.msra.mxu3 %v851_v42 }
 0x664   :  { %v751_v43 = vadd.f32 %v749_v27, %v1162_v8  ;;  %v1337_v8 = vsel %vm766_vm3, %v1059_v53, %v765_v56  ;;  %v850_v27 = vld [vmem:[%s1411_s3 + $0xa8] sm:$0xff] }
 0x665   :  { %878 = vmatpush.msra.mxu3 %v850_v27 }
 0x666   :  { %v755_v45 = vsel %vm32_vm0, %v751_v43, 0.0 }
 0x667   :  { %v742_v46 = vpop.f32.mrf.mxu1  ;;  %756 = vadd.xlane.f32.xlu0 %v755_v45  ;;  %879 = vmatpush.msra.mxu3 %v849_v24 }
 0x668   :  { %v746_v47 = vadd.f32 %v742_v46, %v585_v44 }
 0x66a   :  { %v750_v48 = vadd.f32 %v1019_v40, %v746_v47 }
 0x66c   :  { %v752_v49 = vadd.f32 %v750_v48, %v1181_v13 }
 0x66e   :  { %v758_v50 = vsel %vm32_vm0, %v752_v49, 0.0 }
 0x66f   :  { %759 = vadd.xlane.f32.xlu1 %v758_v50 }
 0x6da   :  { %v757_v57 = vpop.xlane.xlu0 %756 }
 0x6db   :  { %v768_v58 = vmul.f32 %v1337_v8, %v757_v57 }
 0x6dd   :  { %v770_v59 = vsub.f32 %v751_v43, %v768_v58 }
 0x6df   :  { %v772_v60 = vmul.f32 %v770_v59, %v770_v59 }
 0x6e1   :  { %v774_v13 = vsel %vm32_vm0, %v772_v60, 0.0 }
 0x6e2   :  { %775 = vadd.xlane.f32.xlu2 %v774_v13  ;;  %v760_v61 = vpop.xlane.xlu1 %759 }
 0x6e3   :  { %v769_v62 = vmul.f32 %v1337_v8, %v760_v61 }
 0x6e5   :  { %v771_v63 = vsub.f32 %v752_v49, %v769_v62  ;;  %v1023_v49 = vld [vmem:[%s1412_s4 + $0x6] ss:$0 sm:$0xff] }
 0x6e7   :  { %v773_v0 = vmul.f32 %v771_v63, %v771_v63 }
 0x6e9   :  { %v777_v1 = vsel %vm32_vm0, %v773_v0, 0.0 }
 0x6ea   :  { %778 = vadd.xlane.f32.xlu0 %v777_v1 }
 0x755   :  { %v776_v6 = vpop.xlane.xlu2 %775 }
 0x756   :  { %v780_v7 = vmul.f32 %v776_v6, %v1337_v8 }
 0x758   :  { %v782_v9 = vadd.f32 1e-05, %v780_v7 }
 0x75a   :  { %1060 = vrsqrt.f32 %v782_v9  ;;  %vm790_vm5 = vweird.f32 %v782_v9 }
 0x75d   :  { %v779_v18 = vpop.xlane.xlu0 %778 }
 0x75e   :  { %v781_v12 = vmul.f32 %v779_v18, %v1337_v8 }
 0x760   :  { %v1061_v14 = vpop.eup %1060  ;;  %v783_v15 = vadd.f32 1e-05, %v781_v12 }
 0x761   :  { %v785_v16 = vmul.f32 %v1061_v14, %v782_v9  ;;  %vm791_vm4 = vweird.f32 %v1061_v14 }
 0x762   :  { %1062 = vrsqrt.f32 %v783_v15  ;;  %vm792_vm6 = vmor %vm790_vm5, %vm791_vm4  ;;  %vm800_vm8 = vweird.f32 %v783_v15 }
 0x763   :  { %v786_v17 = vmul.f32 %v1061_v14, %v785_v16 }
 0x765   :  { %v787_v19 = vmul.f32 0.5, %v786_v17  ;;  %v1024_v17 = vld [vmem:[%s1412_s4 + $0x7] ss:$0 sm:$0xff] }
 0x767   :  { %v788_v20 = vsub.f32 1.5, %v787_v19 }
 0x768   :  { %v1063_v21 = vpop.eup %1062 }
 0x769   :  { %v789_v25 = vmul.f32 %v1061_v14, %v788_v20  ;;  %v795_v28 = vmul.f32 %v1063_v21, %v783_v15  ;;  %vm801_vm7 = vweird.f32 %v1063_v21 }
 0x76a   :  { %vm802_vm9 = vmor %vm800_vm8, %vm801_vm7 }
 0x76b   :  { %v793_v22 = vsel %vm792_vm6, %v1061_v14, %v789_v25  ;;  %v796_v30 = vmul.f32 %v1063_v21, %v795_v28 }
 0x76c   :  { %v804_v31 = vmul.f32 %v793_v22, %v770_v59 }
 0x76d   :  { %v797_v34 = vmul.f32 0.5, %v796_v30 }
 0x76e   :  { %v807_v23 = vmul.f32 %v1020_v29, %v804_v31 }
 0x76f   :  { %v798_v35 = vsub.f32 1.5, %v797_v34 }
 0x770   :  { %v810_v36 = vadd.f32 %v1021_v32, %v807_v23 }
 0x771   :  { %v799_v37 = vmul.f32 %v1063_v21, %v798_v35 }
 0x772   :  { %997 = vmatmul.msk.f32.vlgmr.msrb.gmra.mxu2 %vm32_vm0, %v810_v36 }
 0x773   :  { %v803_v38 = vsel %vm802_vm9, %v1063_v21, %v799_v37  ;;  %v1025_v21 = vld [vmem:[%s1412_s4 + $0x8] ss:$0 sm:$0xff]  ;;  %s1103_s4 = smov 128  }
 0x774   :  { %v805_v39 = vmul.f32 %v803_v38, %v771_v63 }
 0x776   :  { %v808_v40 = vmul.f32 %v1020_v29, %v805_v39 }
 0x778   :  { %v811_v41 = vadd.f32 %v1021_v32, %v808_v40 }
 0x77a   :  { %998 = vmatmul.msk.f32.gmra.mxu2 %vm32_vm0, %v811_v41 }
 0x7f5   :  { %v841_v43 = vpop.f32.mrf.mxu2 }
 0x7f6   :  { %v842_v44 = vadd.f32 %v1022_v26, %v841_v43 }
 0x7f8   :  { %v847_v45 = vmax.f32 %v842_v44, 0.0 }
 0x7fa   :  { %999 = vmatmul.msk.f32.vlgmr.msra.gmra.mxu3 %vm857_vm10, %v847_v45 }
 0x7fd   :  { %v844_v46 = vpop.f32.mrf.mxu2 }
 0x7fe   :  { %v845_v47 = vadd.f32 %v1022_v26, %v844_v46 }
 0x800   :  { %v848_v48 = vmax.f32 %v845_v47, 0.0 }
 0x802   :  { %1000 = vmatmul.msk.f32.gmra.mxu3 %vm857_vm10, %v848_v48 }
 0x87d   :  { %v881_v50 = vpop.f32.mrf.mxu3 }
 0x87e   :  { %v882_v51 = vadd.f32 %v1023_v49, %v881_v50 }
 0x880   :  { %v887_v53 = vadd.f32 %v882_v51, %v810_v36 }
 0x882   :  { %v891_v54 = vsel %vm32_vm0, %v887_v53, 0.0 }
 0x883   :  { %892 = vadd.xlane.f32.xlu1 %v891_v54 }
 0x885   :  { %v884_v55 = vpop.f32.mrf.mxu3 }
 0x886   :  { %v885_v52 = vadd.f32 %v1023_v49, %v884_v55 }
 0x888   :  { %v888_v56 = vadd.f32 %v885_v52, %v811_v41 }
 0x88a   :  { %v894_v57 = vsel %vm32_vm0, %v888_v56, 0.0 }
 0x88b   :  { %895 = vadd.xlane.f32.xlu0 %v894_v57 }
 0x8f6   :  { %v893_v58 = vpop.xlane.xlu1 %892 }
 0x8f7   :  { %v897_v59 = vmul.f32 %v893_v58, %v1337_v8 }
 0x8f9   :  { %v899_v60 = vsub.f32 %v887_v53, %v897_v59 }
 0x8fb   :  { %v901_v13 = vmul.f32 %v899_v60, %v899_v60 }
 0x8fd   :  { %v903_v61 = vsel %vm32_vm0, %v901_v13, 0.0 }
 0x8fe   :  { %v896_v62 = vpop.xlane.xlu0 %895  ;;  %904 = vadd.xlane.f32.xlu1 %v903_v61 }
 0x8ff   :  { %v898_v63 = vmul.f32 %v896_v62, %v1337_v8 }
 0x901   :  { %v900_v0 = vsub.f32 %v888_v56, %v898_v63 }
 0x903   :  { %v902_v1 = vmul.f32 %v900_v0, %v900_v0 }
 0x905   :  { %v906_v2 = vsel %vm32_vm0, %v902_v1, 0.0 }
 0x906   :  { %907 = vadd.xlane.f32.xlu0 %v906_v2 }
 0x971   :  { %v905_v3 = vpop.xlane.xlu1 %904 }
 0x972   :  { %v909_v4 = vmul.f32 %v905_v3, %v1337_v8 }
 0x974   :  { %v911_v5 = vadd.f32 1e-05, %v909_v4 }
 0x976   :  { %1064 = vrsqrt.f32 %v911_v5  ;;  %vm919_vm12 = vweird.f32 %v911_v5 }
 0x979   :  { %v908_v6 = vpop.xlane.xlu0 %907 }
 0x97a   :  { %v910_v7 = vmul.f32 %v908_v6, %v1337_v8 }
 0x97c   :  { %v1065_v9 = vpop.eup %1064  ;;  %v912_v33 = vadd.f32 1e-05, %v910_v7 }
 0x97d   :  { %v914_v10 = vmul.f32 %v1065_v9, %v911_v5  ;;  %vm920_vm11 = vweird.f32 %v1065_v9 }
 0x97e   :  { %1066 = vrsqrt.f32 %v912_v33  ;;  %vm921_vm13 = vmor %vm919_vm12, %vm920_vm11  ;;  %vm929_vm15 = vweird.f32 %v912_v33 }
 0x97f   :  { %v915_v11 = vmul.f32 %v1065_v9, %v914_v10 }
 0x981   :  { %v916_v18 = vmul.f32 0.5, %v915_v11 }
 0x983   :  { %v917_v12 = vsub.f32 1.5, %v916_v18 }
 0x984   :  { %v1067_v14 = vpop.eup %1066 }
 0x985   :  { %v918_v15 = vmul.f32 %v1065_v9, %v917_v12  ;;  %v924_v16 = vmul.f32 %v1067_v14, %v912_v33  ;;  %vm930_vm14 = vweird.f32 %v1067_v14 }
 0x986   :  { %vm931_vm1 = vmor %vm929_vm15, %vm930_vm14 }
 0x987   :  { %v922_v19 = vsel %vm921_vm13, %v1065_v9, %v918_v15  ;;  %v925_v20 = vmul.f32 %v1067_v14, %v924_v16 }
 0x988   :  { %v933_v8 = vmul.f32 %v922_v19, %v899_v60 }
 0x989   :  { %v926_v25 = vmul.f32 0.5, %v925_v20 }
 0x98a   :  { %v936_v28 = vmul.f32 %v1024_v17, %v933_v8 }
 0x98b   :  { %v927_v29 = vsub.f32 1.5, %v926_v25 }
 0x98c   :  { %v939_v22 = vadd.f32 %v1025_v21, %v936_v28 }
 0x98d   :  { %v928_v30 = vmul.f32 %v1067_v14, %v927_v29 }
 0x98e   :  { %941 = vst.msk [vmem:[#allocation2] sm:$0xff] %vm32_vm0, %v939_v22 }
 0x98f   :  { %v932_v31 = vsel %vm931_vm1, %v1067_v14, %v928_v30 }
 0x990   :  { %v934_v32 = vmul.f32 %v932_v31, %v900_v0 }
 0x992   :  { %v937_v34 = vmul.f32 %v1024_v17, %v934_v32 }
 0x994   :  { %v940_v23 = vadd.f32 %v1025_v21, %v937_v34 }
 0x996   :  { %942 = vst.msk [vmem:[#allocation2 + $0x8] sm:$0xff] %vm32_vm0, %v940_v23 }
 0x997   :  { %955 = dma.vmem_to_hbm [thread:$0]  %s948_s24, 256, %s950_s0, [#allocation3], %s1103_s4, %s1103_s4, %s1104_s27  }
 0x998   :  { %1092 = dma.done.wait [#allocation3], 256  }
 0x999   :  { %1093 = vsyncadd [#allocation3], 4294967040 }
 0x99a   :  { %960 = vsyncpa [#allocation3], 1 }

</bundles_post_ra>
